<compile_context>
chip_gen: v5e
topology: v5e:2x2
jax: 0.10.0
libtpu: 0.0.40
codegen_flags: <defaults>
</compile_context>

<pallas_src>
import jax
import jax.numpy as jnp
from jax.experimental import pallas as pl
from jax.experimental.pallas import tpu as pltpu


def _mlp_kernel(x_ref, w1_ref, b1_ref, w2_ref, b2_ref, o_ref):
    # x: (TB, F) bf16; w1/w2: (F_in, F_out) bf16 (pre-transposed host-side);
    # b1/b2: (1, F) f32. Canonical contraction -> MXU, f32 accumulation.
    h = jnp.dot(x_ref[...], w1_ref[...], preferred_element_type=jnp.float32)
    h = jnp.maximum(h + b1_ref[...], 0.0)                    # f32 bias + ReLU (VPU)
    y = jnp.dot(h.astype(jnp.bfloat16), w2_ref[...],
                preferred_element_type=jnp.float32)
    o_ref[...] = (y + b2_ref[...]).astype(o_ref.dtype)


def prepare_params(w1, b1, w2, b2):
    """One-time parameter conversion (off the per-call hot path).

    PyTorch nn.Linear stores weights as (out, in); transpose ONCE to (in, out)
    so the kernel never pays an in-kernel transpose, and store them as bf16
    (halves weight HBM traffic / VMEM residency, doubles MXU rate).
    Biases become f32 row vectors for broadcasting in the epilogue.
    """
    return (jnp.asarray(w1).T.astype(jnp.bfloat16),
            jnp.asarray(b1).reshape(1, -1).astype(jnp.float32),
            jnp.asarray(w2).T.astype(jnp.bfloat16),
            jnp.asarray(b2).reshape(1, -1).astype(jnp.float32))


def _pick_block_b(batch):
    # bf16 activations need sublane tiles that are multiples of 16; cap the
    # tile at 128 so the f32 intermediate h (block_b, F) doesn't exhaust the
    # 64-vreg register file (a (256,256) f32 h is the entire file).
    if batch <= 128:
        return ((batch + 15) // 16) * 16        # single grid step for small B
    return 128


@jax.jit
def simple_model_forward(x, w1_t, b1_r, w2_t, b2_r):
    """x: (B, F) float; w1_t/w2_t: bf16 (in, out); b1_r/b2_r: f32 (1, F)."""
    B, F = x.shape
    block_b = _pick_block_b(B)
    grid_b = pl.cdiv(B, block_b)
    Bp = grid_b * block_b

    # bf16 activation I/O halves x traffic into the kernel. Callers that
    # already hold bf16 activations pass them in and this cast is a no-op.
    x_bf = x.astype(jnp.bfloat16)
    if Bp != B:
        # Ragged tail only (<16 rows); dead branch when block_b divides B,
        # so no extra full-array HBM pass on the common path.
        x_bf = jnp.pad(x_bf, ((0, Bp - B), (0, 0)))

    # Tiny grids stay on one TensorCore: splitting a 1-2 step grid across the
    # v7x dual TCs would make each core DMA its own private copy of both
    # (F, F) weights for near-zero compute gain.
    semantics = ("parallel",) if grid_b > 2 else ("arbitrary",)

    out = pl.pallas_call(
        _mlp_kernel,
        out_shape=jax.ShapeDtypeStruct((Bp, F), jnp.float32),
        grid_spec=pltpu.PrefetchScalarGridSpec(
            num_scalar_prefetch=0,
            grid=(grid_b,),
            in_specs=[
                pl.BlockSpec((block_b, F), lambda i: (i, 0)),   # x: batch-tiled
                # Weights are VMEM-resident across all batch tiles.
                # TODO(synk): for large F (>=2048) on v7x (64 MiB VMEM), switch
                # these to pipeline_mode=pl.Buffered(1) or tile the output-
                # feature dim so double-buffered (F,F) weights fit.
                pl.BlockSpec((F, F), lambda i: (0, 0)),          # W1 (in, out)
                pl.BlockSpec((1, F), lambda i: (0, 0)),          # b1
                pl.BlockSpec((F, F), lambda i: (0, 0)),          # W2 (in, out)
                pl.BlockSpec((1, F), lambda i: (0, 0)),          # b2
            ],
            out_specs=pl.BlockSpec((block_b, F), lambda i: (i, 0)),
        ),
        compiler_params=pltpu.CompilerParams(
            dimension_semantics=semantics,
        ),
    )(x_bf, w1_t, b1_r, w2_t, b2_r)
    return out if Bp == B else out[:B]


def _init_linear(key, in_f, out_f, dtype=jnp.float32):
    """Deterministic init matching PyTorch nn.Linear default (uniform +/- 1/sqrt(in))."""
    kw, kb = jax.random.split(key)
    bound = 1.0 / jnp.sqrt(jnp.asarray(in_f, dtype))
    w = jax.random.uniform(kw, (out_f, in_f), dtype, minval=-bound, maxval=bound)
    b = jax.random.uniform(kb, (out_f,), dtype, minval=-bound, maxval=bound)
    return w, b


if __name__ == "__main__":
    # Small shapes consistent with the module: feature dim 256 (stand-in for
    # size=1000), batch 16 -> block_b=16, grid=(1,), no padding, single TC.
    SIZE = 256
    BATCH = 16

    key = jax.random.PRNGKey(0)
    kx, k1, k2 = jax.random.split(key, 3)

    x = jax.random.normal(kx, (BATCH, SIZE), jnp.float32)
    w1, b1 = _init_linear(k1, SIZE, SIZE)
    w2, b2 = _init_linear(k2, SIZE, SIZE)

    # One-time parameter prep (transpose + bf16 cast), outside the call path.
    params = prepare_params(w1, b1, w2, b2)

    out = simple_model_forward(x, *params)
    out = jax.block_until_ready(out)

    # Full-f32 PyTorch-equivalent reference; bf16 weights/activations with f32
    # accumulation => loosened tolerance.
    ref = jnp.maximum(x @ w1.T + b1, 0.0) @ w2.T + b2
    assert out.shape == (BATCH, SIZE)
    max_err = float(jnp.max(jnp.abs(out - ref)))
    assert jnp.allclose(out, ref, atol=5e-2, rtol=5e-2), max_err

    print("KERNEL_OK")
</pallas_src>

<mosaic_0001>
module attributes {stable_mosaic.version = 11 : i64} {
  func.func @_mlp_kernel(%arg0: i32, %arg1: memref<16x256xbf16, #tpu.memory_space<vmem>>, %arg2: memref<256x256xbf16, #tpu.memory_space<vmem>>, %arg3: memref<1x256xf32, #tpu.memory_space<vmem>>, %arg4: memref<256x256xbf16, #tpu.memory_space<vmem>>, %arg5: memref<1x256xf32, #tpu.memory_space<vmem>>, %arg6: memref<16x256xf32, #tpu.memory_space<vmem>>) attributes {dimension_semantics = [#tpu.dimension_semantics<arbitrary>], iteration_bounds = array<i64: 1>, scalar_prefetch = 0 : i64, scratch_operands = 0 : i64, tpu.core_type = #tpu.core_type<tc>, window_params = [{transform_indices = @transform_0, window_bounds = array<i64: 16, 256>}, {pipeline_mode = #tpu.pipeline_mode<synchronous>, transform_indices = @transform_1, window_bounds = array<i64: 256, 256>}, {pipeline_mode = #tpu.pipeline_mode<synchronous>, transform_indices = @transform_2, window_bounds = array<i64: 1, 256>}, {pipeline_mode = #tpu.pipeline_mode<synchronous>, transform_indices = @transform_3, window_bounds = array<i64: 256, 256>}, {pipeline_mode = #tpu.pipeline_mode<synchronous>, transform_indices = @transform_4, window_bounds = array<i64: 1, 256>}, {transform_indices = @transform_5, window_bounds = array<i64: 16, 256>}]} {
    %c0 = arith.constant 0 : index
    %c0_0 = arith.constant 0 : index
    %0 = vector.load %arg1[%c0, %c0_0] : memref<16x256xbf16, #tpu.memory_space<vmem>>, vector<16x256xbf16>
    %c0_1 = arith.constant 0 : index
    %c0_2 = arith.constant 0 : index
    %1 = vector.load %arg2[%c0_1, %c0_2] : memref<256x256xbf16, #tpu.memory_space<vmem>>, vector<256x256xbf16>
    %cst = arith.constant dense<0.000000e+00> : vector<16x256xf32>
    %2 = tpu.matmul %0, %1, %cst {dimension_numbers = #tpu.dot_dimension_numbers<[1], [0], [0], [1], [0, 0, 1, 1], [], []>} : vector<16x256xbf16>, vector<256x256xbf16>, vector<16x256xf32> -> vector<16x256xf32>
    %c0_3 = arith.constant 0 : index
    %c0_4 = arith.constant 0 : index
    %3 = vector.load %arg3[%c0_3, %c0_4] : memref<1x256xf32, #tpu.memory_space<vmem>>, vector<1x256xf32>
    %4 = vector.broadcast %3 : vector<1x256xf32> to vector<16x256xf32>
    %5 = arith.addf %2, %4 : vector<16x256xf32>
    %cst_5 = arith.constant 0.000000e+00 : f32
    %6 = vector.broadcast %cst_5 : f32 to vector<16x256xf32>
    %7 = arith.maximumf %5, %6 : vector<16x256xf32>
    %8 = arith.truncf %7 : vector<16x256xf32> to vector<16x256xbf16>
    %c0_6 = arith.constant 0 : index
    %c0_7 = arith.constant 0 : index
    %9 = vector.load %arg4[%c0_6, %c0_7] : memref<256x256xbf16, #tpu.memory_space<vmem>>, vector<256x256xbf16>
    %cst_8 = arith.constant dense<0.000000e+00> : vector<16x256xf32>
    %10 = tpu.matmul %8, %9, %cst_8 {dimension_numbers = #tpu.dot_dimension_numbers<[1], [0], [0], [1], [0, 0, 1, 1], [], []>} : vector<16x256xbf16>, vector<256x256xbf16>, vector<16x256xf32> -> vector<16x256xf32>
    %c0_9 = arith.constant 0 : index
    %c0_10 = arith.constant 0 : index
    %11 = vector.load %arg5[%c0_9, %c0_10] : memref<1x256xf32, #tpu.memory_space<vmem>>, vector<1x256xf32>
    %12 = vector.broadcast %11 : vector<1x256xf32> to vector<16x256xf32>
    %13 = arith.addf %10, %12 : vector<16x256xf32>
    %c0_11 = arith.constant 0 : index
    %c0_12 = arith.constant 0 : index
    %14 = vector.load %arg6[%c0_11, %c0_12] : memref<16x256xf32, #tpu.memory_space<vmem>>, vector<16x256xf32>
    tpu.vector_store %arg6[%c0_11, %c0_12], %13 {strides = array<i32>} : memref<16x256xf32, #tpu.memory_space<vmem>>, vector<16x256xf32>,
    return
  }
  func.func @transform_0(%arg0: i32) -> (i32, i32) {
    %c0_i32 = arith.constant 0 : i32
    %c0_i32_0 = arith.constant 0 : i32
    return %arg0, %c0_i32 : i32, i32
  }
  func.func @transform_1(%arg0: i32) -> (i32, i32) {
    %c0_i32 = arith.constant 0 : i32
    %c0_i32_0 = arith.constant 0 : i32
    %c0_i32_1 = arith.constant 0 : i32
    return %c0_i32, %c0_i32_0 : i32, i32
  }
  func.func @transform_2(%arg0: i32) -> (i32, i32) {
    %c0_i32 = arith.constant 0 : i32
    %c0_i32_0 = arith.constant 0 : i32
    %c0_i32_1 = arith.constant 0 : i32
    return %c0_i32, %c0_i32_0 : i32, i32
  }
  func.func @transform_3(%arg0: i32) -> (i32, i32) {
    %c0_i32 = arith.constant 0 : i32
    %c0_i32_0 = arith.constant 0 : i32
    %c0_i32_1 = arith.constant 0 : i32
    return %c0_i32, %c0_i32_0 : i32, i32
  }
  func.func @transform_4(%arg0: i32) -> (i32, i32) {
    %c0_i32 = arith.constant 0 : i32
    %c0_i32_0 = arith.constant 0 : i32
    %c0_i32_1 = arith.constant 0 : i32
    return %c0_i32, %c0_i32_0 : i32, i32
  }
  func.func @transform_5(%arg0: i32) -> (i32, i32) {
    %c0_i32 = arith.constant 0 : i32
    %c0_i32_0 = arith.constant 0 : i32
    return %arg0, %c0_i32 : i32, i32
  }
}

</mosaic_0001>

<bundles_post_ra>
// kernel: simple_model_forward.1
= control target key start
LH: loop header
LB: loop body
LE: loop exit
PB: predicated region body
PF: predicated region fallthrough
CT: control target
= control target key end

     0   :  { %10 = vsyncpa [#allocation3], 0  ;;  %s1082_s0 = inlined_call_operand.vmem [shape: bf16[16,256], index: 0, kind: input, shape index: {}]   ;;  %s1083_s1 = inlined_call_operand.hbm [shape: bf16[256,256], index: 1, kind: input, shape index: {}]   ;;  %s1084_s2 = inlined_call_operand.vmem [shape: f32[1,256], index: 2, kind: input, shape index: {}]   ;;  %s1085_s3 = inlined_call_operand.hbm [shape: bf16[256,256], index: 3, kind: input, shape index: {}]   ;;  %s1086_s4 = inlined_call_operand.vmem [shape: f32[1,256], index: 4, kind: input, shape index: {}]   ;;  %s1087_s5 = inlined_call_operand.hbm [shape: f32[16,256], index: 5, kind: output, shape index: {}]  }
   0x1   :  { %11 = vsyncpa [#allocation6], 0 }
   0x2   :  { %12 = vsyncpa [#allocation4], 0  ;;  %s19_s20 = sshll.u32 %s1083_s1, 4  ;;  %s1018_s21 = smov [#allocation2]   ;;  %s20_s20 = int_to_ptr.hbm [resolvable:$true] %s19_s20 }
   0x3   :  { %s21_s22 = sshll.u32 %s1018_s21, 4  ;;  %s34_s25 = sshll.u32 %s1085_s3, 4  ;;  %s22_s22 = int_to_ptr.vmem [resolvable:$true] %s21_s22  ;;  %s35_s25 = int_to_ptr.hbm [resolvable:$true] %s34_s25 }
   0x4   :  { %s1019_s26 = smov 128   ;;  %s1020_s27 = smov 8  }
   0x5   :  { %27 = dma.hbm_to_vmem [thread:$0]  %s20_s20, 4096, %s22_s22, [#allocation3], %s1019_s26, %s1019_s26, %s1020_s27  }
   0x6   :  { %s1021_s28 = smov [#allocation5]  }
   0x7   :  { %s36_s29 = sshll.u32 %s1021_s28, 4  ;;  %s37_s29 = int_to_ptr.vmem [resolvable:$true] %s36_s29 }
   0x8   :  { %42 = dma.hbm_to_vmem [thread:$0]  %s35_s25, 4096, %s37_s29, [#allocation6], %s1019_s26, %s1019_s26, %s1020_s27  }
   0x9   :  { %1012 = dma.done.wait [#allocation3], 4096  }
   0xa   :  { %1013 = vsyncadd [#allocation3], 4294963200 }
   0xb   :  { %1014 = dma.done.wait [#allocation6], 4096  }
   0xc   :  { %1015 = vsyncadd [#allocation6], 4294963200  ;;  %v669_v0 = vld [vmem:[#allocation2 + $0x70] sm:$0xf]  ;;  %v884_v1 = vld [vmem:[#allocation2 + $0x74] sm:$0xf0] }
   0xd   :  { %v733_v2 = vld [vmem:[#allocation2 + $0xf0] sm:$0xf]  ;;  %v670_v3 = vor.u32 %v884_v1, %v669_v0  ;;  %v900_v4 = vld [vmem:[#allocation2 + $0xf4] sm:$0xf0]  ;;  %v883_v5 = vld [vmem:[#allocation2 + $0x74] sm:$0xf] }
   0xe   :  { %v671_v6 = vld [vmem:[#allocation2 + $0x78] sm:$0xf0]  ;;  %v734_v7 = vor.u32 %v900_v4, %v733_v2  ;;  %v899_v9 = vld [vmem:[#allocation2 + $0xf4] sm:$0xf]  ;;  %v661_v11 = vld [vmem:[#allocation2 + $0x60] sm:$0xf] }
   0xf   :  { %v674_v8 = vor.u32 %v883_v5, %v671_v6  ;;  %v735_v10 = vld [vmem:[#allocation2 + $0xf8] sm:$0xf0]  ;;  %263 = vmatpush.bf16.msra.mxu0 %v670_v3  ;;  %v882_v13 = vld [vmem:[#allocation2 + $0x64] sm:$0xf0]  ;;  %v725_v14 = vld [vmem:[#allocation2 + $0xe0] sm:$0xf] }
  0x10   :  { %v738_v12 = vor.u32 %v899_v9, %v735_v10  ;;  %v898_v15 = vld [vmem:[#allocation2 + $0xe4] sm:$0xf0]  ;;  %277 = vmatpush.bf16.msra.mxu1 %v734_v7  ;;  %v662_v16 = vor.u32 %v882_v13, %v661_v11  ;;  %v881_v18 = vld [vmem:[#allocation2 + $0x64] sm:$0xf]  ;;  %v663_v19 = vld [vmem:[#allocation2 + $0x68] sm:$0xf0] }
  0x11   :  { %291 = vmatpush.bf16.msra.mxu2 %v674_v8  ;;  %v726_v17 = vor.u32 %v898_v15, %v725_v14  ;;  %v897_v20 = vld [vmem:[#allocation2 + $0xe4] sm:$0xf]  ;;  %v666_v21 = vor.u32 %v881_v18, %v663_v19  ;;  %v727_v22 = vld [vmem:[#allocation2 + $0xe8] sm:$0xf0]  ;;  %v653_v23 = vld [vmem:[#allocation2 + $0x50] sm:$0xf] }
  0x12   :  { %305 = vmatpush.bf16.msra.mxu3 %v738_v12  ;;  %v880_v24 = vld [vmem:[#allocation2 + $0x54] sm:$0xf0]  ;;  %v730_v25 = vor.u32 %v897_v20, %v727_v22  ;;  %v717_v26 = vld [vmem:[#allocation2 + $0xd0] sm:$0xf]  ;;  %v879_v28 = vld [vmem:[#allocation2 + $0x54] sm:$0xf] }
  0x13   :  { %v896_v27 = vld [vmem:[#allocation2 + $0xd4] sm:$0xf0]  ;;  %264 = vmatpush.bf16.msra.mxu0 %v662_v16  ;;  %v654_v29 = vor.u32 %v880_v24, %v653_v23  ;;  %v655_v30 = vld [vmem:[#allocation2 + $0x58] sm:$0xf0]  ;;  %v895_v31 = vld [vmem:[#allocation2 + $0xd4] sm:$0xf] }
  0x14   :  { %v719_v32 = vld [vmem:[#allocation2 + $0xd8] sm:$0xf0]  ;;  %278 = vmatpush.bf16.msra.mxu1 %v726_v17  ;;  %v718_v33 = vor.u32 %v896_v27, %v717_v26  ;;  %v658_v34 = vor.u32 %v879_v28, %v655_v30  ;;  %v645_v35 = vld [vmem:[#allocation2 + $0x40] sm:$0xf]  ;;  %v878_v36 = vld [vmem:[#allocation2 + $0x44] sm:$0xf0] }
  0x15   :  { %292 = vmatpush.bf16.msra.mxu2 %v666_v21  ;;  %v709_v37 = vld [vmem:[#allocation2 + $0xc0] sm:$0xf]  ;;  %v722_v38 = vor.u32 %v895_v31, %v719_v32  ;;  %v894_v39 = vld [vmem:[#allocation2 + $0xc4] sm:$0xf0]  ;;  %v877_v40 = vld [vmem:[#allocation2 + $0x44] sm:$0xf]  ;;  %v646_v44 = vor.u32 %v878_v36, %v645_v35 }
  0x16   :  { %306 = vmatpush.bf16.msra.mxu3 %v730_v25  ;;  %v647_v41 = vld [vmem:[#allocation2 + $0x48] sm:$0xf0]  ;;  %v893_v42 = vld [vmem:[#allocation2 + $0xc4] sm:$0xf]  ;;  %v710_v45 = vor.u32 %v894_v39, %v709_v37  ;;  %v637_v47 = vld [vmem:[#allocation2 + $0x30] sm:$0xf] }
  0x17   :  { %v711_v43 = vld [vmem:[#allocation2 + $0xc8] sm:$0xf0]  ;;  %265 = vmatpush.bf16.msra.mxu0 %v654_v29  ;;  %v650_v46 = vor.u32 %v877_v40, %v647_v41  ;;  %v876_v48 = vld [vmem:[#allocation2 + $0x34] sm:$0xf0]  ;;  %v701_v49 = vld [vmem:[#allocation2 + $0xb0] sm:$0xf] }
  0x18   :  { %279 = vmatpush.bf16.msra.mxu1 %v718_v33  ;;  %v714_v50 = vor.u32 %v893_v42, %v711_v43  ;;  %v892_v51 = vld [vmem:[#allocation2 + $0xb4] sm:$0xf0]  ;;  %v875_v52 = vld [vmem:[#allocation2 + $0x34] sm:$0xf]  ;;  %v639_v53 = vld [vmem:[#allocation2 + $0x38] sm:$0xf0]  ;;  %v638_v56 = vor.u32 %v876_v48, %v637_v47 }
  0x19   :  { %293 = vmatpush.bf16.msra.mxu2 %v658_v34  ;;  %v891_v54 = vld [vmem:[#allocation2 + $0xb4] sm:$0xf]  ;;  %v703_v55 = vld [vmem:[#allocation2 + $0xb8] sm:$0xf0]  ;;  %v702_v57 = vor.u32 %v892_v51, %v701_v49  ;;  %v642_v58 = vor.u32 %v875_v52, %v639_v53  ;;  %v629_v59 = vld [vmem:[#allocation2 + $0x20] sm:$0xf] }
  0x1a   :  { %307 = vmatpush.bf16.msra.mxu3 %v722_v38  ;;  %v874_v60 = vld [vmem:[#allocation2 + $0x24] sm:$0xf0]  ;;  %v693_v61 = vld [vmem:[#allocation2 + $0xa0] sm:$0xf]  ;;  %v706_v62 = vor.u32 %v891_v54, %v703_v55  ;;  %v873_v0 = vld [vmem:[#allocation2 + $0x24] sm:$0xf] }
  0x1b   :  { %266 = vmatpush.bf16.msra.mxu0 %v646_v44  ;;  %v890_v63 = vld [vmem:[#allocation2 + $0xa4] sm:$0xf0]  ;;  %v631_v1 = vld [vmem:[#allocation2 + $0x28] sm:$0xf0]  ;;  %v889_v2 = vld [vmem:[#allocation2 + $0xa4] sm:$0xf]  ;;  %v630_v4 = vor.u32 %v874_v60, %v629_v59 }
  0x1c   :  { %280 = vmatpush.bf16.msra.mxu1 %v710_v45  ;;  %v695_v3 = vld [vmem:[#allocation2 + $0xa8] sm:$0xf0]  ;;  %v694_v5 = vor.u32 %v890_v63, %v693_v61  ;;  %v634_v6 = vor.u32 %v873_v0, %v631_v1  ;;  %v621_v7 = vld [vmem:[#allocation2 + $0x10] sm:$0xf]  ;;  %v872_v8 = vld [vmem:[#allocation2 + $0x14] sm:$0xf0] }
  0x1d   :  { %294 = vmatpush.bf16.msra.mxu2 %v650_v46  ;;  %v685_v9 = vld [vmem:[#allocation2 + $0x90] sm:$0xf]  ;;  %v698_v10 = vor.u32 %v889_v2, %v695_v3  ;;  %v888_v11 = vld [vmem:[#allocation2 + $0x94] sm:$0xf0]  ;;  %v871_v12 = vld [vmem:[#allocation2 + $0x14] sm:$0xf]  ;;  %v622_v16 = vor.u32 %v872_v8, %v621_v7 }
  0x1e   :  { %308 = vmatpush.bf16.msra.mxu3 %v714_v50  ;;  %v623_v13 = vld [vmem:[#allocation2 + $0x18] sm:$0xf0]  ;;  %v887_v14 = vld [vmem:[#allocation2 + $0x94] sm:$0xf]  ;;  %v613_v17 = vld [vmem:[#allocation2] sm:$0xf]  ;;  %v686_v19 = vor.u32 %v888_v11, %v685_v9 }
  0x1f   :  { %267 = vmatpush.bf16.msra.mxu0 %v638_v56  ;;  %v687_v15 = vld [vmem:[#allocation2 + $0x98] sm:$0xf0]  ;;  %v870_v18 = vld [vmem:[#allocation2 + $0x4] sm:$0xf0]  ;;  %v626_v20 = vor.u32 %v871_v12, %v623_v13  ;;  %v677_v21 = vld [vmem:[#allocation2 + $0x80] sm:$0xf] }
  0x20   :  { %281 = vmatpush.bf16.msra.mxu1 %v702_v57  ;;  %v886_v22 = vld [vmem:[#allocation2 + $0x84] sm:$0xf0]  ;;  %v869_v23 = vld [vmem:[#allocation2 + $0x4] sm:$0xf]  ;;  %v690_v24 = vor.u32 %v887_v14, %v687_v15  ;;  %v615_v25 = vld [vmem:[#allocation2 + $0x8] sm:$0xf0]  ;;  %v614_v31 = vor.u32 %v870_v18, %v613_v17 }
  0x21   :  { %295 = vmatpush.bf16.msra.mxu2 %v642_v58  ;;  %v885_v26 = vld [vmem:[#allocation2 + $0x84] sm:$0xf]  ;;  %v679_v27 = vld [vmem:[#allocation2 + $0x88] sm:$0xf0]  ;;  %v605_v28 = vld [vmem:[%s1082_s0] sm:$0xf]  ;;  %v678_v35 = vor.u32 %v886_v22, %v677_v21  ;;  %v618_v36 = vor.u32 %v869_v23, %v615_v25 }
  0x22   :  { %309 = vmatpush.bf16.msra.mxu3 %v706_v62  ;;  %v797_v29 = vld [vmem:[#allocation5 + $0x70] sm:$0xf]  ;;  %v916_v30 = vld [vmem:[#allocation5 + $0x74] sm:$0xf0]  ;;  %v868_v32 = vld [vmem:[%s1082_s0 + $0x4] sm:$0xf0]  ;;  %v682_v39 = vor.u32 %v885_v26, %v679_v27 }
  0x23   :  { %268 = vmatpush.bf16.msra.mxu0 %v630_v4  ;;  %v915_v33 = vld [vmem:[#allocation5 + $0x74] sm:$0xf]  ;;  %v799_v34 = vld [vmem:[#allocation5 + $0x78] sm:$0xf0]  ;;  %v867_v37 = vld [vmem:[%s1082_s0 + $0x4] sm:$0xf]  ;;  %v798_v40 = vor.u32 %v916_v30, %v797_v29  ;;  %v606_v44 = vor.u32 %v868_v32, %v605_v28 }
  0x24   :  { %282 = vmatpush.bf16.msra.mxu1 %v694_v5  ;;  %v607_v38 = vld [vmem:[%s1082_s0 + $0x8] sm:$0xf0]  ;;  %v789_v41 = vld [vmem:[#allocation5 + $0x60] sm:$0xf]  ;;  %v861_v42 = vld [vmem:[#allocation5 + $0xf0] sm:$0xf]  ;;  %v802_v45 = vor.u32 %v915_v33, %v799_v34 }
  0x25   :  { %296 = vmatpush.bf16.msra.mxu2 %v634_v6  ;;  %v932_v43 = vld [vmem:[#allocation5 + $0xf4] sm:$0xf0]  ;;  %v914_v46 = vld [vmem:[#allocation5 + $0x64] sm:$0xf0]  ;;  %v931_v47 = vld [vmem:[#allocation5 + $0xf4] sm:$0xf]  ;;  %v610_v49 = vor.u32 %v867_v37, %v607_v38 }
  0x26   :  { %310 = vmatpush.bf16.msra.mxu3 %v698_v10  ;;  %v863_v48 = vld [vmem:[#allocation5 + $0xf8] sm:$0xf0]  ;;  %v913_v50 = vld [vmem:[#allocation5 + $0x64] sm:$0xf]  ;;  %v791_v51 = vld [vmem:[#allocation5 + $0x68] sm:$0xf0]  ;;  %v862_v52 = vor.u32 %v932_v43, %v861_v42  ;;  %v790_v53 = vor.u32 %v914_v46, %v789_v41 }
  0x27   :  { %269 = vmatpush.bf16.msra.mxu0 %v622_v16  ;;  %v866_v54 = vor.u32 %v931_v47, %v863_v48  ;;  %v781_v55 = vld [vmem:[#allocation5 + $0x50] sm:$0xf]  ;;  %v853_v56 = vld [vmem:[#allocation5 + $0xe0] sm:$0xf]  ;;  %v930_v57 = vld [vmem:[#allocation5 + $0xe4] sm:$0xf0]  ;;  %v794_v58 = vor.u32 %v913_v50, %v791_v51 }
  0x28   :  { %283 = vmatpush.bf16.msra.mxu1 %v686_v19  ;;  %v912_v59 = vld [vmem:[#allocation5 + $0x54] sm:$0xf0]  ;;  %v929_v60 = vld [vmem:[#allocation5 + $0xe4] sm:$0xf]  ;;  %v855_v61 = vld [vmem:[#allocation5 + $0xe8] sm:$0xf0]  ;;  %v854_v0 = vor.u32 %v930_v57, %v853_v56 }
  0x29   :  { %297 = vmatpush.bf16.msra.mxu2 %v626_v20  ;;  %v911_v62 = vld [vmem:[#allocation5 + $0x54] sm:$0xf]  ;;  %v783_v63 = vld [vmem:[#allocation5 + $0x58] sm:$0xf0]  ;;  %v782_v1 = vor.u32 %v912_v59, %v781_v55  ;;  %v858_v2 = vor.u32 %v929_v60, %v855_v61  ;;  %v773_v4 = vld [vmem:[#allocation5 + $0x40] sm:$0xf] }
  0x2a   :  { %311 = vmatpush.bf16.msra.mxu3 %v690_v24  ;;  %v786_v3 = vor.u32 %v911_v62, %v783_v63  ;;  %v910_v5 = vld [vmem:[#allocation5 + $0x44] sm:$0xf0]  ;;  %v909_v6 = vld [vmem:[#allocation5 + $0x44] sm:$0xf]  ;;  %v775_v7 = vld [vmem:[#allocation5 + $0x48] sm:$0xf0] }
  0x2b   :  { %270 = vmatpush.bf16.msra.mxu0 %v614_v31  ;;  %v774_v8 = vor.u32 %v910_v5, %v773_v4  ;;  %v778_v9 = vor.u32 %v909_v6, %v775_v7  ;;  %v845_v10 = vld [vmem:[#allocation5 + $0xd0] sm:$0xf]  ;;  %v928_v11 = vld [vmem:[#allocation5 + $0xd4] sm:$0xf0]  ;;  %v927_v12 = vld [vmem:[#allocation5 + $0xd4] sm:$0xf] }
  0x2c   :  { %284 = vmatpush.bf16.msra.mxu1 %v678_v35  ;;  %v846_v13 = vor.u32 %v928_v11, %v845_v10  ;;  %v847_v14 = vld [vmem:[#allocation5 + $0xd8] sm:$0xf0]  ;;  %v765_v16 = vld [vmem:[#allocation5 + $0x30] sm:$0xf]  ;;  %v908_v17 = vld [vmem:[#allocation5 + $0x34] sm:$0xf0] }
  0x2d   :  { %298 = vmatpush.bf16.msra.mxu2 %v618_v36  ;;  %v850_v15 = vor.u32 %v927_v12, %v847_v14  ;;  %v907_v18 = vld [vmem:[#allocation5 + $0x34] sm:$0xf]  ;;  %v766_v19 = vor.u32 %v908_v17, %v765_v16  ;;  %v767_v20 = vld [vmem:[#allocation5 + $0x38] sm:$0xf0]  ;;  %v837_v22 = vld [vmem:[#allocation5 + $0xc0] sm:$0xf] }
  0x2e   :  { %312 = vmatpush.bf16.msra.mxu3 %v682_v39  ;;  %271 = vmatmul.bf16.vlgmr.msra.gmra.mxu0 %v606_v44  ;;  %v770_v21 = vor.u32 %v907_v18, %v767_v20  ;;  %v926_v23 = vld [vmem:[#allocation5 + $0xc4] sm:$0xf0]  ;;  %v925_v24 = vld [vmem:[#allocation5 + $0xc4] sm:$0xf]  ;;  %v839_v26 = vld [vmem:[#allocation5 + $0xc8] sm:$0xf0] }
  0x2f   :  { %523 = vmatpush.bf16.msrb.mxu0 %v798_v40  ;;  %285 = vmatmul.bf16.vlgmr.msra.gmra.mxu1 %v610_v49  ;;  %v838_v25 = vor.u32 %v926_v23, %v837_v22  ;;  %v842_v27 = vor.u32 %v925_v24, %v839_v26  ;;  %v757_v28 = vld [vmem:[#allocation5 + $0x20] sm:$0xf]  ;;  %v906_v29 = vld [vmem:[#allocation5 + $0x24] sm:$0xf0]  ;;  %v905_v31 = vld [vmem:[#allocation5 + $0x24] sm:$0xf] }
  0x30   :  { %299 = vmatmul.bf16.vlgmr.msra.gmra.mxu2 %v606_v44  ;;  %537 = vmatpush.bf16.msrb.mxu1 %v862_v52  ;;  %v758_v30 = vor.u32 %v906_v29, %v757_v28  ;;  %v759_v32 = vld [vmem:[#allocation5 + $0x28] sm:$0xf0]  ;;  %v829_v34 = vld [vmem:[#allocation5 + $0xb0] sm:$0xf]  ;;  %v924_v35 = vld [vmem:[#allocation5 + $0xb4] sm:$0xf0] }
  0x31   :  { %551 = vmatpush.bf16.msrb.mxu2 %v802_v45  ;;  %313 = vmatmul.bf16.vlgmr.msra.gmra.mxu3 %v610_v49  ;;  %v762_v33 = vor.u32 %v905_v31, %v759_v32  ;;  %v923_v36 = vld [vmem:[#allocation5 + $0xb4] sm:$0xf]  ;;  %v830_v37 = vor.u32 %v924_v35, %v829_v34  ;;  %v831_v38 = vld [vmem:[#allocation5 + $0xb8] sm:$0xf0]  ;;  %v749_v40 = vld [vmem:[#allocation5 + $0x10] sm:$0xf] }
  0x32   :  { %565 = vmatpush.bf16.msrb.mxu3 %v866_v54  ;;  %v834_v39 = vor.u32 %v923_v36, %v831_v38  ;;  %v904_v41 = vld [vmem:[#allocation5 + $0x14] sm:$0xf0]  ;;  %v903_v42 = vld [vmem:[#allocation5 + $0x14] sm:$0xf]  ;;  %v751_v44 = vld [vmem:[#allocation5 + $0x18] sm:$0xf0] }
  0x33   :  { %524 = vmatpush.bf16.msrb.mxu0 %v790_v53  ;;  %v750_v43 = vor.u32 %v904_v41, %v749_v40  ;;  %v754_v45 = vor.u32 %v903_v42, %v751_v44  ;;  %v821_v46 = vld [vmem:[#allocation5 + $0xa0] sm:$0xf]  ;;  %v922_v47 = vld [vmem:[#allocation5 + $0xa4] sm:$0xf0]  ;;  %v921_v48 = vld [vmem:[#allocation5 + $0xa4] sm:$0xf] }
  0x34   :  { %538 = vmatpush.bf16.msrb.mxu1 %v854_v0  ;;  %v822_v49 = vor.u32 %v922_v47, %v821_v46  ;;  %v823_v50 = vld [vmem:[#allocation5 + $0xa8] sm:$0xf0]  ;;  %v741_v52 = vld [vmem:[#allocation5] sm:$0xf]  ;;  %v902_v53 = vld [vmem:[#allocation5 + $0x4] sm:$0xf0] }
  0x35   :  { %552 = vmatpush.bf16.msrb.mxu2 %v794_v58  ;;  %v826_v51 = vor.u32 %v921_v48, %v823_v50  ;;  %v901_v54 = vld [vmem:[#allocation5 + $0x4] sm:$0xf]  ;;  %v742_v55 = vor.u32 %v902_v53, %v741_v52  ;;  %v743_v56 = vld [vmem:[#allocation5 + $0x8] sm:$0xf0]  ;;  %v813_v58 = vld [vmem:[#allocation5 + $0x90] sm:$0xf] }
  0x36   :  { %566 = vmatpush.bf16.msrb.mxu3 %v858_v2  ;;  %v746_v57 = vor.u32 %v901_v54, %v743_v56  ;;  %v920_v59 = vld [vmem:[#allocation5 + $0x94] sm:$0xf0]  ;;  %v919_v60 = vld [vmem:[#allocation5 + $0x94] sm:$0xf]  ;;  %v815_v62 = vld [vmem:[#allocation5 + $0x98] sm:$0xf0] }
  0x37   :  { %525 = vmatpush.bf16.msrb.mxu0 %v782_v1  ;;  %v814_v61 = vor.u32 %v920_v59, %v813_v58  ;;  %v818_v63 = vor.u32 %v919_v60, %v815_v62  ;;  %v805_v0 = vld [vmem:[#allocation5 + $0x80] sm:$0xf]  ;;  %v918_v1 = vld [vmem:[#allocation5 + $0x84] sm:$0xf0]  ;;  %v917_v2 = vld [vmem:[#allocation5 + $0x84] sm:$0xf] }
  0x38   :  { %539 = vmatpush.bf16.msrb.mxu1 %v846_v13  ;;  %v807_v4 = vld [vmem:[#allocation5 + $0x88] sm:$0xf0]  ;;  %v87_v6 = vld [vmem:[%s1084_s2] sm:$0x3]  ;;  %s1022_s13 = smov [#allocation7]   ;;  %s589_s16 = sshll.u32 %s1087_s5, 4  ;;  %s590_s16 = int_to_ptr.hbm [resolvable:$true] %s589_s16 }
  0x39   :  { %553 = vmatpush.bf16.msrb.mxu2 %v786_v3  ;;  %v806_v3 = vor.u32 %v918_v1, %v805_v0  ;;  %v810_v5 = vor.u32 %v917_v2, %v807_v4  ;;  %v90_v12 = vperm.slane %v87_v6, 1  ;;  %v357_v31 = vld [vmem:[%s1086_s4] sm:$0x3]  ;;  %s587_s4 = sshll.u32 %s1022_s13, 4  ;;  %s1023_s17 = smov 256   ;;  %s588_s4 = int_to_ptr.vmem [resolvable:$true] %s587_s4 }
  0x3a   :  { %567 = vmatpush.bf16.msrb.mxu3 %v850_v15  ;;  %v360_v38 = vperm.slane %v357_v31, 1  ;;  %s1024_s18 = smov 16  }
  0x3b   :  { %526 = vmatpush.bf16.msrb.mxu0 %v774_v8  ;;  %v89_v8 = vperm.slane %v87_v6, 0 }
  0x3c   :  { %540 = vmatpush.bf16.msrb.mxu1 %v838_v25 }
  0x3d   :  { %554 = vmatpush.bf16.msrb.mxu2 %v778_v9 }
  0x3e   :  { %568 = vmatpush.bf16.msrb.mxu3 %v842_v27 }
  0x3f   :  { %527 = vmatpush.bf16.msrb.mxu0 %v766_v19 }
  0x40   :  { %541 = vmatpush.bf16.msrb.mxu1 %v830_v37 }
  0x41   :  { %555 = vmatpush.bf16.msrb.mxu2 %v770_v21 }
  0x42   :  { %569 = vmatpush.bf16.msrb.mxu3 %v834_v39 }
  0x43   :  { %528 = vmatpush.bf16.msrb.mxu0 %v758_v30 }
  0x44   :  { %542 = vmatpush.bf16.msrb.mxu1 %v822_v49 }
  0x45   :  { %556 = vmatpush.bf16.msrb.mxu2 %v762_v33  ;;  %v359_v33 = vperm.slane %v357_v31, 0 }
  0x46   :  { %570 = vmatpush.bf16.msrb.mxu3 %v826_v51 }
  0x47   :  { %529 = vmatpush.bf16.msrb.mxu0 %v750_v43 }
  0x48   :  { %543 = vmatpush.bf16.msrb.mxu1 %v814_v61 }
  0x49   :  { %557 = vmatpush.bf16.msrb.mxu2 %v754_v45 }
  0x4a   :  { %571 = vmatpush.bf16.msrb.mxu3 %v818_v63 }
  0x4b   :  { %530 = vmatpush.bf16.msrb.mxu0 %v742_v55 }
  0x4c   :  { %544 = vmatpush.bf16.msrb.mxu1 %v806_v3 }
  0x4d   :  { %558 = vmatpush.bf16.msrb.mxu2 %v746_v57 }
  0x4e   :  { %572 = vmatpush.bf16.msrb.mxu3 %v810_v5 }
  0xab   :  { %v272_v7 = vpop.f32.mrf.mxu0 }
  0xac   :  { %v286_v9 = vpop.f32.mrf.mxu1  ;;  %v273_v10 = vadd.f32 %v272_v7, %v89_v8 }
  0xae   :  { %v287_v15 = vadd.f32 %v286_v9, %v273_v10 }
  0xb0   :  { %v319_v20 = vmax.f32 %v287_v15, 0.0 }
  0xb3   :  { %v300_v11 = vpop.f32.mrf.mxu2  ;;  %v274_v14 = vpop.f32.mrf.mxu0 }
  0xb4   :  { %v314_v13 = vpop.f32.mrf.mxu3  ;;  %v275_v16 = vadd.f32 %v274_v14, %v89_v8  ;;  %v288_v17 = vpop.f32.mrf.mxu1  ;;  %v301_v19 = vadd.f32 %v300_v11, %v90_v12 }
  0xb6   :  { %v289_v18 = vadd.f32 %v288_v17, %v275_v16  ;;  %v315_v24 = vadd.f32 %v314_v13, %v301_v19 }
  0xb8   :  { %v321_v21 = vmax.f32 %v289_v18, 0.0  ;;  %v320_v28 = vmax.f32 %v315_v24, 0.0 }
  0xba   :  { %v323_v22 = vpack.c.bf16 %v321_v21, %v319_v20 }
  0xbb   :  { %v302_v23 = vpop.f32.mrf.mxu2 }
  0xbc   :  { %v303_v25 = vadd.f32 %v302_v23, %v90_v12  ;;  %v316_v26 = vpop.f32.mrf.mxu3  ;;  %531 = vmatmul.bf16.vlgmr.msrb.gmra.mxu0 %v323_v22  ;;  %559 = vmatmul.bf16.vlgmr.msrb.gmra.mxu2 %v323_v22 }
  0xbe   :  { %v317_v27 = vadd.f32 %v316_v26, %v303_v25 }
  0xc0   :  { %v322_v29 = vmax.f32 %v317_v27, 0.0 }
  0xc2   :  { %v324_v30 = vpack.c.bf16 %v322_v29, %v320_v28 }
  0xc4   :  { %545 = vmatmul.bf16.vlgmr.msrb.gmra.mxu1 %v324_v30  ;;  %573 = vmatmul.bf16.vlgmr.msrb.gmra.mxu3 %v324_v30 }
 0x139   :  { %v532_v32 = vpop.f32.mrf.mxu0 }
 0x13a   :  { %v533_v34 = vadd.f32 %v532_v32, %v359_v33 }
 0x13f   :  { %v560_v36 = vpop.f32.mrf.mxu2 }
 0x140   :  { %v561_v40 = vadd.f32 %v560_v36, %v360_v38 }
 0x141   :  { %v546_v35 = vpop.f32.mrf.mxu1  ;;  %v534_v39 = vpop.f32.mrf.mxu0 }
 0x142   :  { %v547_v37 = vadd.f32 %v546_v35, %v533_v34  ;;  %v535_v42 = vadd.f32 %v534_v39, %v359_v33 }
 0x144   :  { %579 = vst [vmem:[#allocation7] sm:$0xff] %v547_v37 }
 0x147   :  { %v574_v41 = vpop.f32.mrf.mxu3  ;;  %v562_v46 = vpop.f32.mrf.mxu2 }
 0x148   :  { %v575_v43 = vadd.f32 %v574_v41, %v561_v40  ;;  %v563_v47 = vadd.f32 %v562_v46, %v360_v38 }
 0x149   :  { %v548_v44 = vpop.f32.mrf.mxu1 }
 0x14a   :  { %580 = vst [vmem:[#allocation7 + $0x8] sm:$0xff] %v575_v43  ;;  %v549_v45 = vadd.f32 %v548_v44, %v535_v42 }
 0x14c   :  { %581 = vst [vmem:[#allocation7 + $0x10] sm:$0xff] %v549_v45 }
 0x14f   :  { %v576_v48 = vpop.f32.mrf.mxu3 }
 0x150   :  { %v577_v49 = vadd.f32 %v576_v48, %v563_v47 }
 0x152   :  { %582 = vst [vmem:[#allocation7 + $0x18] sm:$0xff] %v577_v49 }
 0x153   :  { %595 = dma.vmem_to_hbm [thread:$0]  %s588_s4, 512, %s590_s16, [#allocation4], %s1023_s17, %s1023_s17, %s1024_s18  }
 0x154   :  { %1016 = dma.done.wait [#allocation4], 512  }
 0x155   :  { %1017 = vsyncadd [#allocation4], 4294966784 }
 0x156   :  { %600 = vsyncpa [#allocation3], 1 }
 0x157   :  { %601 = vsyncpa [#allocation6], 1 }
 0x158   :  { %602 = vsyncpa [#allocation4], 1 }

</bundles_post_ra>
